<compile_context>
chip_gen: v7x
topology: tpu7x:2x2x1
jax: 0.10.0
libtpu: 0.0.40
codegen_flags: <defaults>
</compile_context>

<pallas_src>
import functools
import math

import jax
import jax.numpy as jnp
from jax.experimental import pallas as pl
from jax.experimental.pallas import tpu as pltpu


# ---------------------------------------------------------------------------
# Kernel 1: QKV projection (K-tiled + N-tiled matmul, head-major output)
# ---------------------------------------------------------------------------
def qkv_proj_kernel(x_ref, w_ref, out_ref, acc_ref, *, heads_per_group, head_dim):
    k = pl.program_id(4)                       # contraction (D) tile index

    @pl.when(k == 0)
    def _():
        acc_ref[...] = jnp.zeros_like(acc_ref)

    # (tq, tk) @ (tk, tn) -> f32 accumulate on the MXU.
    acc_ref[...] += jnp.dot(x_ref[...], w_ref[...],
                            preferred_element_type=jnp.float32)

    @pl.when(k == pl.num_programs(4) - 1)
    def _():
        acc = acc_ref[...]                     # (tq, tn) f32
        # Head-major relayout paid once here (static, small unroll: only the
        # heads of this column group).
        for h in range(heads_per_group):
            out_ref[h] = acc[:, h * head_dim:(h + 1) * head_dim].astype(out_ref.dtype)


# ---------------------------------------------------------------------------
# Kernel 2: flash (online-softmax) causal attention
# ---------------------------------------------------------------------------
def flash_attn_kernel(q_ref, k_ref, v_ref, o_ref, m_sc, l_sc, acc_sc, *,
                      tq: int, tkv: int, approx_recip: bool):
    i = pl.program_id(2)
    j = pl.program_id(3)

    @pl.when(j == 0)
    def _():
        m_sc[...] = jnp.full_like(m_sc, -jnp.inf)
        l_sc[...] = jnp.zeros_like(l_sc)
        acc_sc[...] = jnp.zeros_like(acc_sc)

    q_start = i * tq
    k_start = j * tkv

    def update(apply_mask):
        def body():
            q = q_ref[...]                     # (tq,  hd)
            k = k_ref[...]                     # (tkv, hd)
            v = v_ref[...]                     # (tkv, hd)
            # q @ k^T without an explicit transpose: contract the last dims.
            s = jax.lax.dot_general(q, k, (((1,), (1,)), ((), ())),
                                    preferred_element_type=jnp.float32)
            if apply_mask:
                # Compact broadcast mask: (tq,1) rows vs (1,tkv) cols.
                row = q_start + jax.lax.broadcasted_iota(jnp.int32, (tq, 1), 0)
                col = k_start + jax.lax.broadcasted_iota(jnp.int32, (1, tkv), 1)
                s = jnp.where(row >= col, s, -jnp.inf)
            m_prev = m_sc[...]
            m_new = jnp.maximum(m_prev, s.max(axis=-1, keepdims=True))
            alpha = jnp.exp(m_prev - m_new)
            p = jnp.exp(s - m_new)
            l_sc[...] = alpha * l_sc[...] + p.sum(axis=-1, keepdims=True)
            acc_sc[...] = alpha * acc_sc[...] + jnp.dot(
                p.astype(v.dtype), v, preferred_element_type=jnp.float32)
            m_sc[...] = m_new
        return body

    # Block classification:
    #   fully above diagonal  -> skipped entirely (DMA also skipped via the
    #                            clamped index_map in the wrapper).
    #   fully at/below diag   -> unmasked update (no iota/compare/select).
    #   straddles the diag    -> masked update.
    no_mask_needed = k_start + tkv <= q_start + 1
    straddles = jnp.logical_and(k_start < q_start + tq,
                                jnp.logical_not(no_mask_needed))
    pl.when(no_mask_needed)(update(False))
    pl.when(straddles)(update(True))

    @pl.when(j == pl.num_programs(3) - 1)
    def _():
        if approx_recip:
            inv_l = pl.reciprocal(l_sc[...], approx=True)   # EUP slot
        else:
            inv_l = 1.0 / l_sc[...]                          # exact for f32 path
        o_ref[...] = (acc_sc[...] * inv_l).astype(o_ref.dtype)


# ---------------------------------------------------------------------------
# Kernel 3: out projection (all heads per step; full-D contraction when
#           head_dim is lane-aligned; lane-dense (tq, tn) output stores)
# ---------------------------------------------------------------------------
def out_proj_kernel(ctx_ref, w_ref, o_ref, *, n_heads, head_dim, fuse_full_d):
    if fuse_full_d:
        # Lane-concatenate the heads (128-aligned slabs) -> one D-deep MXU pass.
        xcat = jnp.concatenate([ctx_ref[h] for h in range(n_heads)], axis=-1)
        acc = jnp.dot(xcat, w_ref[...], preferred_element_type=jnp.float32)
    else:
        # Safe fallback for head_dim not a multiple of 128: per-head accumulate.
        acc = jnp.dot(ctx_ref[0], w_ref[0:head_dim, :],
                      preferred_element_type=jnp.float32)
        for h in range(1, n_heads):
            acc += jnp.dot(ctx_ref[h], w_ref[h * head_dim:(h + 1) * head_dim, :],
                           preferred_element_type=jnp.float32)
    o_ref[...] = acc.astype(o_ref.dtype)


# ---------------------------------------------------------------------------
# Wrapper
# ---------------------------------------------------------------------------
def _divisor_tile(dim: int, target: int, granule: int = 1) -> int:
    """Largest granule-multiple divisor of `dim` that is <= target.

    Falls back to `dim` (i.e. the full extent, always layout-legal) if no such
    divisor exists, so the returned tile never violates the (8,128) rule.
    """
    if dim <= target:
        return dim
    t = (min(target, dim) // granule) * granule
    while t >= granule:
        if dim % t == 0:
            return t
        t -= granule
    return dim


def gpt_attention(x, w_in_t, w_out_t, n_heads, *,
                  compute_dtype=jnp.bfloat16,
                  proj_tq=512, proj_tk=512, proj_tn=512,
                  flash_tq=512, flash_tkv=512,
                  out_tq=512, out_tn=1024,
                  vmem_limit_bytes=48 * 1024 * 1024):
    """Causal MHA forward: out_proj(attn(in_proj(x))), bias-free, eval mode."""
    B, T, D = x.shape
    assert D % n_heads == 0
    hd = D // n_heads
    scale = float(hd) ** -0.5

    # ---- tile selection (divisors only; sublane granule 8, lane granule 128) ----
    proj_tq = _divisor_tile(T, proj_tq, 8)
    flash_tq = _divisor_tile(T, flash_tq, 8)
    flash_tkv = _divisor_tile(T, flash_tkv, 8)
    out_tq = _divisor_tile(T, out_tq, 8)
    proj_tk = _divisor_tile(D, proj_tk, 128)
    lcm_hd = hd * 128 // math.gcd(hd, 128)
    proj_tn = _divisor_tile(D, proj_tn, lcm_hd)    # multiple of hd and of 128 (or == D)
    out_tn = _divisor_tile(D, out_tn, 128)

    gpp = D // proj_tn              # weight column groups per projection
    hpg = proj_tn // hd             # heads per column group

    # Fold the softmax scale into W_q (f32, once), split W_in per projection
    # (keeps every weight block lane-aligned), then cast MXU operands.
    w_in_3 = jnp.stack([w_in_t[:, :D] * scale,
                        w_in_t[:, D:2 * D],
                        w_in_t[:, 2 * D:]], axis=0).astype(compute_dtype)  # (3, D, D)
    w_out_c = w_out_t.astype(compute_dtype)                                # (D, D)
    x_c = x.astype(compute_dtype)

    cp_extra = dict(vmem_limit_bytes=vmem_limit_bytes) if vmem_limit_bytes else {}

    # ---- 1) QKV projection -> head-major qkv_h (B, 3, H, T, hd) -------------
    qkv_h = pl.pallas_call(
        functools.partial(qkv_proj_kernel, heads_per_group=hpg, head_dim=hd),
        out_shape=jax.ShapeDtypeStruct((B, 3, n_heads, T, hd), compute_dtype),
        grid_spec=pltpu.PrefetchScalarGridSpec(
            num_scalar_prefetch=0,
            grid=(B, T // proj_tq, 3, gpp, D // proj_tk),
            in_specs=[
                pl.BlockSpec((None, proj_tq, proj_tk),
                             lambda b, i, p, g, k: (b, i, k)),
                pl.BlockSpec((None, proj_tk, proj_tn),
                             lambda b, i, p, g, k: (p, k, g)),
            ],
            out_specs=pl.BlockSpec((None, None, hpg, proj_tq, hd),
                                   lambda b, i, p, g, k: (b, p, g, i, 0)),
            scratch_shapes=[pltpu.VMEM((proj_tq, proj_tn), jnp.float32)],
        ),
        compiler_params=pltpu.CompilerParams(
            dimension_semantics=("parallel", "parallel", "parallel", "parallel",
                                 "arbitrary"),
            **cp_extra),
    )(x_c, w_in_3)

    # ---- 2) flash attention over (B, H, q_tiles, kv_tiles) ------------------
    nq = T // flash_tq
    nkv = T // flash_tkv

    def kv_index(b, h, i, j, proj):
        # Clamp to the last causally-needed kv block: skipped above-diagonal
        # steps keep the same block index, so no K/V DMA is issued for them.
        j_last = ((i + 1) * flash_tq - 1) // flash_tkv
        return (b, proj, h, jnp.minimum(j, j_last), 0)

    # NOTE(v5e): if K/V DMA latency is exposed under the small per-step
    # compute, add pipeline_mode=pl.Buffered(3) on the k/v BlockSpecs.
    ctx = pl.pallas_call(
        functools.partial(flash_attn_kernel, tq=flash_tq, tkv=flash_tkv,
                          approx_recip=(compute_dtype != jnp.float32)),
        out_shape=jax.ShapeDtypeStruct((B, n_heads, T, hd), compute_dtype),
        grid_spec=pltpu.PrefetchScalarGridSpec(
            num_scalar_prefetch=0,
            grid=(B, n_heads, nq, nkv),
            in_specs=[
                pl.BlockSpec((None, None, None, flash_tq, hd),
                             lambda b, h, i, j: (b, 0, h, i, 0)),
                pl.BlockSpec((None, None, None, flash_tkv, hd),
                             lambda b, h, i, j: kv_index(b, h, i, j, 1)),
                pl.BlockSpec((None, None, None, flash_tkv, hd),
                             lambda b, h, i, j: kv_index(b, h, i, j, 2)),
            ],
            out_specs=pl.BlockSpec((None, None, flash_tq, hd),
                                   lambda b, h, i, j: (b, h, i, 0)),
            scratch_shapes=[
                pltpu.VMEM((flash_tq, 1), jnp.float32),    # running max m
                pltpu.VMEM((flash_tq, 1), jnp.float32),    # running denom l
                pltpu.VMEM((flash_tq, hd), jnp.float32),   # un-normalized out
            ],
        ),
        compiler_params=pltpu.CompilerParams(
            dimension_semantics=("parallel", "parallel", "parallel", "arbitrary"),
            **cp_extra),
    )(qkv_h, qkv_h, qkv_h)

    # ---- 3) out projection: all heads per step, W_out resident when it fits -
    y = pl.pallas_call(
        functools.partial(out_proj_kernel, n_heads=n_heads, head_dim=hd,
                          fuse_full_d=(hd % 128 == 0)),
        out_shape=jax.ShapeDtypeStruct((B, T, D), x.dtype),
        grid_spec=pltpu.PrefetchScalarGridSpec(
            num_scalar_prefetch=0,
            grid=(B, T // out_tq, D // out_tn),
            in_specs=[
                pl.BlockSpec((None, n_heads, out_tq, hd),
                             lambda b, i, n: (b, 0, i, 0)),
                pl.BlockSpec((D, out_tn), lambda b, i, n: (0, n)),
            ],
            out_specs=pl.BlockSpec((None, out_tq, out_tn),
                                   lambda b, i, n: (b, i, n)),
        ),
        compiler_params=pltpu.CompilerParams(
            dimension_semantics=("parallel", "parallel", "parallel"),
            **cp_extra),
    )(ctx, w_out_c)

    return y


# ---------------------------------------------------------------------------
# Pure-JAX reference (mirrors the PyTorch forward, eval mode, bias=False)
# ---------------------------------------------------------------------------
def reference(x, w_in_t, w_out_t, n_heads):
    B, T, D = x.shape
    hd = D // n_heads
    qkv = x @ w_in_t                                        # (B, T, 3D)
    qkv = qkv.reshape(B, T, 3, n_heads, hd)
    q = qkv[:, :, 0].transpose(0, 2, 1, 3)                  # (B, H, T, hd)
    k = qkv[:, :, 1].transpose(0, 2, 1, 3)
    v = qkv[:, :, 2].transpose(0, 2, 1, 3)
    s = jnp.einsum("bhqd,bhkd->bhqk", q, k) / jnp.sqrt(jnp.float32(hd))
    mask = jnp.tril(jnp.ones((T, T), dtype=bool))
    s = jnp.where(mask, s, -jnp.inf)
    p = jax.nn.softmax(s, axis=-1)
    o = jnp.einsum("bhqk,bhkd->bhqd", p, v)
    o = o.transpose(0, 2, 1, 3).reshape(B, T, D)
    return o @ w_out_t


if __name__ == "__main__":
    # --- test 1: tiny shapes (B=2, T=8, D=32, H=4), per-head fallback paths --
    B, T, D, H = 2, 8, 32, 4
    kx, kin, kout = jax.random.split(jax.random.PRNGKey(0), 3)
    x = jax.random.normal(kx, (B, T, D), dtype=jnp.float32)
    w_in_t = jax.random.normal(kin, (D, 3 * D), dtype=jnp.float32) * 0.05
    w_out_t = jax.random.normal(kout, (D, D), dtype=jnp.float32) * 0.05

    ref = reference(x, w_in_t, w_out_t, H)

    out_f32 = jax.block_until_ready(
        gpt_attention(x, w_in_t, w_out_t, H, compute_dtype=jnp.float32))
    assert out_f32.shape == (B, T, D)
    assert jnp.allclose(out_f32, ref, atol=2e-3, rtol=2e-3), "f32 path mismatch"

    out_bf16 = jax.block_until_ready(gpt_attention(x, w_in_t, w_out_t, H))
    assert jnp.allclose(out_bf16, ref, atol=3e-2, rtol=3e-2), "bf16 path mismatch"

    # --- test 2: multi-tile path (T=256, D=256, hd=128) exercising N-tiled
    #     qkv (gpp=2), causal kv clamp/skip (ftq=64, ftkv=128), masked vs
    #     unmasked flash blocks, full-D out-proj contraction, N-tiled W_out.
    B2, T2, D2, H2 = 1, 256, 256, 2
    k0, k1, k2 = jax.random.split(jax.random.PRNGKey(1), 3)
    x2 = jax.random.normal(k0, (B2, T2, D2), dtype=jnp.float32)
    w_in2 = jax.random.normal(k1, (D2, 3 * D2), dtype=jnp.float32) * 0.05
    w_out2 = jax.random.normal(k2, (D2, D2), dtype=jnp.float32) * 0.05
    ref2 = reference(x2, w_in2, w_out2, H2)

    tiled_kwargs = dict(proj_tq=64, proj_tk=128, proj_tn=128,
                        flash_tq=64, flash_tkv=128, out_tq=64, out_tn=128)

    out2 = jax.block_until_ready(
        gpt_attention(x2, w_in2, w_out2, H2, compute_dtype=jnp.float32,
                      **tiled_kwargs))
    assert jnp.allclose(out2, ref2, atol=2e-2, rtol=2e-2), "tiled f32 mismatch"

    out2b = jax.block_until_ready(
        gpt_attention(x2, w_in2, w_out2, H2, **tiled_kwargs))
    assert jnp.allclose(out2b, ref2, atol=5e-2, rtol=5e-2), "tiled bf16 mismatch"

    print("KERNEL_OK")
</pallas_src>

<mosaic_0001>
module attributes {stable_mosaic.version = 11 : i64} {
  func.func @qkv_proj_kernel(%arg0: i32, %arg1: i32, %arg2: i32, %arg3: i32, %arg4: i32, %arg5: memref<1x8x32xf32, #tpu.memory_space<vmem>>, %arg6: memref<1x32x32xf32, #tpu.memory_space<vmem>>, %arg7: memref<1x1x4x8x8xf32, #tpu.memory_space<vmem>>, %arg8: memref<8x32xf32, #tpu.memory_space<vmem>>) attributes {dimension_semantics = [#tpu.dimension_semantics<parallel>, #tpu.dimension_semantics<parallel>, #tpu.dimension_semantics<parallel>, #tpu.dimension_semantics<parallel>, #tpu.dimension_semantics<arbitrary>], iteration_bounds = array<i64: 2, 1, 3, 1, 1>, scalar_prefetch = 0 : i64, scratch_operands = 1 : i64, tpu.core_type = #tpu.core_type<tc>, window_params = [{transform_indices = @transform_0, window_bounds = array<i64: 1, 8, 32>}, {transform_indices = @transform_1, window_bounds = array<i64: 1, 32, 32>}, {transform_indices = @transform_2, window_bounds = array<i64: 1, 1, 4, 8, 8>}]} {
    %c0_i32 = arith.constant 0 : i32
    %0 = arith.cmpi eq, %arg4, %c0_i32 : i32
    %1 = arith.extui %0 : i1 to i32
    %c0_i32_0 = arith.constant 0 : i32
    %2 = arith.cmpi ne, %1, %c0_i32_0 : i32
    scf.if %2 {
      %cst_12 = arith.constant 0.000000e+00 : f32
      %14 = vector.broadcast %cst_12 : f32 to vector<8x32xf32>
      %c0_13 = arith.constant 0 : index
      %c0_14 = arith.constant 0 : index
      %15 = vector.load %arg8[%c0_13, %c0_14] : memref<8x32xf32, #tpu.memory_space<vmem>>, vector<8x32xf32>
      tpu.vector_store %arg8[%c0_13, %c0_14], %14 {strides = array<i32>} : memref<8x32xf32, #tpu.memory_space<vmem>>, vector<8x32xf32>,
    } else {
    }
    %c0 = arith.constant 0 : index
    %c0_1 = arith.constant 0 : index
    %3 = vector.load %arg8[%c0, %c0_1] : memref<8x32xf32, #tpu.memory_space<vmem>>, vector<8x32xf32>
    %c0_2 = arith.constant 0 : index
    %c0_3 = arith.constant 0 : index
    %c0_4 = arith.constant 0 : index
    %4 = vector.load %arg5[%c0_2, %c0_3, %c0_4] : memref<1x8x32xf32, #tpu.memory_space<vmem>>, vector<1x8x32xf32>
    %5 = vector.shape_cast %4 : vector<1x8x32xf32> to vector<8x32xf32>
    %c0_5 = arith.constant 0 : index
    %c0_6 = arith.constant 0 : index
    %c0_7 = arith.constant 0 : index
    %6 = vector.load %arg6[%c0_5, %c0_6, %c0_7] : memref<1x32x32xf32, #tpu.memory_space<vmem>>, vector<1x32x32xf32>
    %7 = vector.shape_cast %6 : vector<1x32x32xf32> to vector<32x32xf32>
    %cst = arith.constant dense<0.000000e+00> : vector<8x32xf32>
    %8 = tpu.matmul %5, %7, %cst {dimension_numbers = #tpu.dot_dimension_numbers<[1], [0], [0], [1], [0, 0, 1, 1], [], []>} : vector<8x32xf32>, vector<32x32xf32>, vector<8x32xf32> -> vector<8x32xf32>
    %9 = arith.addf %3, %8 : vector<8x32xf32>
    %c0_8 = arith.constant 0 : index
    %c0_9 = arith.constant 0 : index
    %10 = vector.load %arg8[%c0_8, %c0_9] : memref<8x32xf32, #tpu.memory_space<vmem>>, vector<8x32xf32>
    tpu.vector_store %arg8[%c0_8, %c0_9], %9 {strides = array<i32>} : memref<8x32xf32, #tpu.memory_space<vmem>>, vector<8x32xf32>,
    %c0_i32_10 = arith.constant 0 : i32
    %11 = arith.cmpi eq, %arg4, %c0_i32_10 : i32
    %12 = arith.extui %11 : i1 to i32
    %c0_i32_11 = arith.constant 0 : i32
    %13 = arith.cmpi ne, %12, %c0_i32_11 : i32
    scf.if %13 {
      %c0_12 = arith.constant 0 : index
      %c0_13 = arith.constant 0 : index
      %14 = vector.load %arg8[%c0_12, %c0_13] : memref<8x32xf32, #tpu.memory_space<vmem>>, vector<8x32xf32>
      %15 = vector.extract_strided_slice %14 {offsets = [0, 0], sizes = [8, 8], strides = [1, 1]} : vector<8x32xf32> to vector<8x8xf32>
      %c0_14 = arith.constant 0 : index
      %c0_15 = arith.constant 0 : index
      %c0_16 = arith.constant 0 : index
      %c0_17 = arith.constant 0 : index
      %c0_18 = arith.constant 0 : index
      %16 = vector.load %arg7[%c0_14, %c0_15, %c0_16, %c0_17, %c0_18] : memref<1x1x4x8x8xf32, #tpu.memory_space<vmem>>, vector<1x1x1x8x8xf32>
      %17 = vector.shape_cast %16 : vector<1x1x1x8x8xf32> to vector<8x8xf32>
      %18 = vector.shape_cast %15 : vector<8x8xf32> to vector<1x1x1x8x8xf32>
      tpu.vector_store %arg7[%c0_14, %c0_15, %c0_16, %c0_17, %c0_18], %18 {strides = array<i32>} : memref<1x1x4x8x8xf32, #tpu.memory_space<vmem>>, vector<1x1x1x8x8xf32>,
      %19 = vector.extract_strided_slice %14 {offsets = [0, 8], sizes = [8, 8], strides = [1, 1]} : vector<8x32xf32> to vector<8x8xf32>
      %c0_19 = arith.constant 0 : index
      %c0_20 = arith.constant 0 : index
      %c1 = arith.constant 1 : index
      %c0_21 = arith.constant 0 : index
      %c0_22 = arith.constant 0 : index
      %20 = vector.load %arg7[%c0_19, %c0_20, %c1, %c0_21, %c0_22] : memref<1x1x4x8x8xf32, #tpu.memory_space<vmem>>, vector<1x1x1x8x8xf32>
      %21 = vector.shape_cast %20 : vector<1x1x1x8x8xf32> to vector<8x8xf32>
      %22 = vector.shape_cast %19 : vector<8x8xf32> to vector<1x1x1x8x8xf32>
      tpu.vector_store %arg7[%c0_19, %c0_20, %c1, %c0_21, %c0_22], %22 {strides = array<i32>} : memref<1x1x4x8x8xf32, #tpu.memory_space<vmem>>, vector<1x1x1x8x8xf32>,
      %23 = vector.extract_strided_slice %14 {offsets = [0, 16], sizes = [8, 8], strides = [1, 1]} : vector<8x32xf32> to vector<8x8xf32>
      %c0_23 = arith.constant 0 : index
      %c0_24 = arith.constant 0 : index
      %c2 = arith.constant 2 : index
      %c0_25 = arith.constant 0 : index
      %c0_26 = arith.constant 0 : index
      %24 = vector.load %arg7[%c0_23, %c0_24, %c2, %c0_25, %c0_26] : memref<1x1x4x8x8xf32, #tpu.memory_space<vmem>>, vector<1x1x1x8x8xf32>
      %25 = vector.shape_cast %24 : vector<1x1x1x8x8xf32> to vector<8x8xf32>
      %26 = vector.shape_cast %23 : vector<8x8xf32> to vector<1x1x1x8x8xf32>
      tpu.vector_store %arg7[%c0_23, %c0_24, %c2, %c0_25, %c0_26], %26 {strides = array<i32>} : memref<1x1x4x8x8xf32, #tpu.memory_space<vmem>>, vector<1x1x1x8x8xf32>,
      %27 = vector.extract_strided_slice %14 {offsets = [0, 24], sizes = [8, 8], strides = [1, 1]} : vector<8x32xf32> to vector<8x8xf32>
      %c0_27 = arith.constant 0 : index
      %c0_28 = arith.constant 0 : index
      %c3 = arith.constant 3 : index
      %c0_29 = arith.constant 0 : index
      %c0_30 = arith.constant 0 : index
      %28 = vector.load %arg7[%c0_27, %c0_28, %c3, %c0_29, %c0_30] : memref<1x1x4x8x8xf32, #tpu.memory_space<vmem>>, vector<1x1x1x8x8xf32>
      %29 = vector.shape_cast %28 : vector<1x1x1x8x8xf32> to vector<8x8xf32>
      %30 = vector.shape_cast %27 : vector<8x8xf32> to vector<1x1x1x8x8xf32>
      tpu.vector_store %arg7[%c0_27, %c0_28, %c3, %c0_29, %c0_30], %30 {strides = array<i32>} : memref<1x1x4x8x8xf32, #tpu.memory_space<vmem>>, vector<1x1x1x8x8xf32>,
    } else {
    }
    return
  }
  func.func @transform_0(%arg0: i32, %arg1: i32, %arg2: i32, %arg3: i32, %arg4: i32) -> (i32, i32, i32) {
    %c0_i32 = arith.constant 0 : i32
    return %arg0, %arg1, %arg4 : i32, i32, i32
  }
  func.func @transform_1(%arg0: i32, %arg1: i32, %arg2: i32, %arg3: i32, %arg4: i32) -> (i32, i32, i32) {
    %c0_i32 = arith.constant 0 : i32
    return %arg2, %arg4, %arg3 : i32, i32, i32
  }
  func.func @transform_2(%arg0: i32, %arg1: i32, %arg2: i32, %arg3: i32, %arg4: i32) -> (i32, i32, i32, i32, i32) {
    %c0_i32 = arith.constant 0 : i32
    %c0_i32_0 = arith.constant 0 : i32
    return %arg0, %arg2, %arg3, %arg1, %c0_i32 : i32, i32, i32, i32, i32
  }
}

</mosaic_0001>

<bundles_post_ra>
// kernel: tpu_custom_call.1
= control target key start
LH: loop header
LB: loop body
LE: loop exit
PB: predicated region body
PF: predicated region fallthrough
CT: control target
= control target key end

     0   :  { %s1264_s0 = inlined_call_operand.hbm [shape: f32[2,8,32], index: 0, kind: input, shape index: {}]   ;;  %s1265_s1 = inlined_call_operand.hbm [shape: f32[3,32,32], index: 1, kind: input, shape index: {}]   ;;  %s1266_s2 = inlined_call_operand.hbm [shape: f32[2,3,4,8,8], index: 2, kind: output, shape index: {}]  }
   0x1   :  { %1278 = sst [smem:[#allocation18_spill]] %s1264_s0 }
   0x2   :  { %1279 = sst [smem:[#allocation19_spill]] %s1266_s2 }
   0x3   :  { %7 = vsyncpa [#allocation4], 0 }
   0x4   :  { %9 = vsyncpa [#allocation4 + $0x1], 0 }
   0x5   :  { %10 = vsyncpa [#allocation7], 0 }
   0x6   :  { %12 = vsyncpa [#allocation7 + $0x1], 0 }
   0x7   :  { %13 = vsyncpa [#allocation5], 0 }
   0x8   :  { %15 = vsyncpa [#allocation5 + $0x1], 0  ;;  %s937_s9 = smov 0   ;;  %s939_s10 = smov 0  }
   0x9   :  { %s941_s11 = smov 0   ;;  %s943_s12 = smov 0  }
   0xa   :  { %s945_s13 = smov 0   ;;  %s947_s14 = smov 0  }
   0xb   :  { %s949_s15 = smov 0   ;;  %s951_s16 = smov 0  }
   0xc   :  { %s953_s17 = smov 0   ;;  %s955_s18 = smov 0  }
   0xd   :  { %s957_s19 = smov 0   ;;  %s959_s20 = smov 0  }
   0xe   :  { %s961_s21 = smov 0   ;;  %s963_s22 = smov 0  }
   0xf LB: > { %1280 = sst [smem:[#allocation12_spill]] %s855_s9  ;;  %s510_s23 = sadd.s32 4294967295, %s907_s22   ;;  %s907_s22 = sphi %s963_s22, %s21_s22   ;;  %s903_s21 = sphi %s961_s21, %s1311_s21   ;;  %s899_s20 = sphi %s959_s20, %s1323_s20   ;;  %s895_s19 = sphi %s957_s19, %s1322_s19   ;;  %s891_s18 = sphi %s955_s18, %s1321_s18   ;;  %s887_s17 = sphi %s953_s17, %s1320_s17   ;;  %s883_s16 = sphi %s951_s16, %s1319_s16   ;;  %s879_s15 = sphi %s949_s15, %s1318_s15   ;;  %s875_s14 = sphi %s947_s14, %s1317_s14   ;;  %s871_s13 = sphi %s945_s13, %s1316_s13   ;;  %s867_s12 = sphi %s943_s12, %s1315_s12   ;;  %s863_s11 = sphi %s941_s11, %s1314_s11   ;;  %s859_s10 = sphi %s939_s10, %s1313_s10   ;;  %s855_s9 = sphi %s937_s9, %s1312_s9  }
  0x10   : > { %1281 = sst [smem:[#allocation13_spill]] %s903_s21  ;;  %s54_s24 = sadd.s32 1, %s903_s21 }
  0x11   : > { %1282 = sst [smem:[#allocation14_spill]] %s907_s22  ;;  %p72_p0 = scmp.ne.s32.totalorder %s887_s17, %s883_s16 }
  0x12   : > { %p73_p1 = scmp.eq.s32.totalorder %s907_s22, 0  ;;  %p78_p2 = scmp.ne.s32.totalorder %s883_s16, %s879_s15 }
  0x13   : > { %p79_p3 = scmp.eq.s32.totalorder %s510_s23, 0  ;;  %p102_p4 = scmp.ne.s32.totalorder %s875_s14, %s871_s13 }
  0x14   : > { %p1012_p5 = por %p73_p1, %p72_p0  ;;  %p108_p6 = scmp.ne.s32.totalorder %s871_s13, %s867_s12 }
  0x15   : > { %p1017_p7 = por %p79_p3, %p78_p2  ;;  %p104_p8 = por %p102_p4, %p73_p1 }
  0x16   : > { %p1021_p9 = por %p108_p6, %p79_p3  ;;  %p1025_p10 = scmp.eq.s32.totalorder %s510_s23, 5 }
  0x17   : > { %s1284_s27 = scalar_select %p1017_p7, 1, 0 }
  0x18   : > { %s1285_s28 = scalar_select %p1021_p9, 1, 0 }
  0x19   : > { %p573_p11 = scmp.lt.s32.totalorder %s907_s22, 6  ;;  %s164_s30 = sand.u32 1, %s887_s17  }
  0x1a   : > { %s515_s3 = sshll.u32 %s903_s21, 7  ;;  %s514_s4 = sshll.u32 %s164_s30, 3 }
  0x1b   : > { %s1287_s0 = sld [smem:[#allocation18_spill]]  ;;  %s168_s8 = scalar_lea.vmem [#allocation3], %s514_s4 }
  0x1c   : > { %s177_s12 = sshll.u32 %s168_s8, 4  ;;  %p1039_p12 = pnand %p573_p11, %p1012_p5  ;;  %s1043_s12 = int_to_ptr.vmem [resolvable:$true] %s177_s12 }
  0x1d   : > { %p1045_p13 = pnand %p573_p11, %p104_p8 }
  0x1e   : > { %p699_p2 = pneg %p1039_p12 }
  0x1f   : > { %s1289_s23 = scalar_select %p1045_p13, 1, 0 }
  0x21   : > { %s1035_s7 = scalar_lea.hbm %s1287_s0, %s515_s3  ;;  %s165_s3 = scalar_lea.sflag [#allocation4], %s164_s30 }
  0x22   : > { %s697_s5 = scalar_lea.hbm %s1035_s7, 128  ;;  %s702_s6 = scalar_lea.hbm %s1287_s0, 256 }
  0x23   : > { %p698_p1 = scmp.ne.s32.totalorder %s1035_s7, %s697_s5  ;;  %p703_p5 = scmp.lt.u32.totalorder %s1035_s7, %s1287_s0 }
  0x24   : > { %p704_p6 = scmp.lt.u32.totalorder %s702_s6, %s697_s5  ;;  %p706_p11 = scmp.lt.u32.totalorder %s697_s5, %s1035_s7 }
  0x25   : > { %p700_p3 = pnand %p699_p2, %p698_p1 }
  0x26   : > { %p705_p8 = por %p704_p6, %p703_p5 }
  0x27   : > { %p701_p4 = pneg %p700_p3 }
  0x28   : > { %p707_p0 = por %p706_p11, %p705_p8 }
  0x2a   : > { %p708_p9 = pnand %p707_p0, %p701_p4 }
  0x2c   : > { %711 = shalt.err (!%p708_p9)
}
  0x2d   : > { %s712_s30 = scalar_lea.vmem %s1043_s12, 128  ;;  %s909_s26 = smov [#allocation3]  }
  0x2e   : > { %p713_p1 = scmp.ne.s32.totalorder %s1043_s12, %s712_s30  ;;  %s717_s4 = sshll.u32 %s909_s26, 4  ;;  %s718_s4 = int_to_ptr.vmem [resolvable:$false] %s717_s4 }
  0x2f   : > { %s719_s25 = scalar_lea.vmem %s718_s4, 256  ;;  %p720_p13 = scmp.lt.s32.totalorder %s1043_s12, %s718_s4 }
  0x30   : > { %p715_p3 = pnand %p713_p1, %p699_p2  ;;  %p721_p5 = scmp.lt.s32.totalorder %s719_s25, %s712_s30 }
  0x32   : > { %p716_p7 = pneg %p715_p3  ;;  %p722_p6 = por %p721_p5, %p720_p13 }
  0x34   : > { %p723_p8 = pnand %p722_p6, %p716_p7 }
  0x36   : > { %726 = shalt.err (!%p723_p8)
}
  0x37   : > { %565 = dma.hbm_to_vmem [thread:$0]  (!%p1039_p12), %s1035_s7, 128, %s1043_s12, %s165_s3  }
  0x38   : > { %p206_p7 = scmp.lt.s32.totalorder %s907_s22, 7  ;;  %p1290_p9 = scmp.ge.s32.totalorder %s907_s22, 1 }
  0x39   : > { %s511_s5 = sadd.s32 4294967294, %s907_s22   ;;  %s46_s6 = sadd.s32 1, %s899_s20 }
  0x3a   : > { %p1078_p13 = pnand %p1290_p9, %p206_p7  ;;  %s95_s8 = sadd.s32 1, %s875_s14 }
  0x3b   : > { %p48_p0 = scmp.ge.s32.totalorder %s46_s6, 3  ;;  %s127_s30 = sadd.s32 1, %s863_s11 }
  0x3c   : > { %p137_p2 = scmp.ne.s32.totalorder %s863_s11, %s859_s10  ;;  %p143_p4 = scmp.ne.s32.totalorder %s859_s10, %s855_s9 }
  0x3d   : > { %s1325_s6 = smov (%p48_p0, %s46_s6), 0  ;;  %s1327_s24 = smov (!%p48_p0, %s54_s24), %s903_s21 }
  0x3e   : > { %1292 = sst [smem:[#allocation15_spill]] %s1325_s6  ;;  %s88_s7 = ssub.s32 %s899_s20, %s1325_s6 }
  0x3f   : > { %p1099_p12 = por %p1025_p10, %p137_p2  ;;  %p56_p11 = scmp.ge.s32.totalorder %s1327_s24, 2 }
  0x40   : > { %p93_p1 = scmp.eq.s32.totalorder %s88_s7, 0  ;;  %p144_p3 = scmp.eq.s32.totalorder %s511_s5, 5 }
  0x41   : > { %s1293_s12 = scalar_select %p1099_p12, 1, 0 }
  0x42   : > { %s184_s3 = sand.u32 1, %s875_s14   ;;  %s1329_s24 = smov (%p56_p11, %s1327_s24), 0 }
  0x43   : > { %1294 = sst [smem:[#allocation16_spill]] %s1329_s24  ;;  %s58_s4 = ssub.s32 %s903_s21, %s1329_s24 }
  0x44   : > { %s1107_s26 = scalar_select %p93_p1, %s875_s14, %s95_s8  }
  0x45   : > { %p1111_p5 = por %p144_p3, %p143_p4  ;;  %p63_p10 = scmp.eq.s32.totalorder %s58_s4, 0 }
  0x46   : > { %1295 = sst [smem:[#allocation17_spill]] %s1107_s26  ;;  %s120_s29 = sor.u32 %s88_s7, %s58_s4 }
  0x47   : > { %s1296_s25 = scalar_select %p1111_p5, 1, 0 }
  0x48   : > { %p125_p6 = scmp.eq.s32.totalorder %s120_s29, 0  ;;  %s1297_s0 = sadd.s32 1, %s887_s17 }
  0x49   : > { %s1118_s6 = scalar_select %p63_p10, %s887_s17, %s1297_s0  }
  0x4a   : > { %s1121_s5 = scalar_select %p125_p6, %s863_s11, %s127_s30  }
  0x4b   : > { %s516_s9 = sshll.u32 %s184_s3, 5  ;;  %s532_s22 = sshll.u32 %s899_s20, 9 }
  0x4c   : > { %s1127_s24 = scalar_lea.hbm %s1265_s1, %s532_s22  ;;  %s188_s21 = scalar_lea.vmem [#allocation6], %s516_s9 }
  0x4d   : > { %s198_s26 = sshll.u32 %s188_s21, 4  ;;  %s1131_s7 = scalar_lea.sflag [#allocation7], %s184_s3  ;;  %s1129_s26 = int_to_ptr.vmem [resolvable:$true] %s198_s26 }
  0x4e   : > { %s727_s0 = scalar_lea.hbm %s1127_s24, 512  ;;  %p1298_p7 = scmp.ne.s32.totalorder %s1289_s23, 0 }
  0x4f   : > { %p728_p8 = scmp.ne.s32.totalorder %s1127_s24, %s727_s0  ;;  %s732_s30 = scalar_lea.hbm %s1265_s1, 1536 }
  0x50   : > { %p729_p9 = pneg %p1298_p7  ;;  %p733_p4 = scmp.lt.u32.totalorder %s1127_s24, %s1265_s1 }
  0x51   : > { %p734_p11 = scmp.lt.u32.totalorder %s732_s30, %s727_s0  ;;  %p736_p3 = scmp.lt.u32.totalorder %s727_s0, %s1127_s24 }
  0x52   : > { %p730_p0 = pnand %p729_p9, %p728_p8 }
  0x53   : > { %p735_p1 = por %p734_p11, %p733_p4 }
  0x54   : > { %p731_p2 = pneg %p730_p0 }
  0x55   : > { %p737_p10 = por %p736_p3, %p735_p1 }
  0x57   : > { %p738_p6 = pnand %p737_p10, %p731_p2 }
  0x59   : > { %741 = shalt.err (!%p738_p6)
}
  0x5a   : > { %s742_s9 = scalar_lea.vmem %s1129_s26, 512  ;;  %s910_s21 = smov [#allocation6]  }
  0x5b   : > { %p743_p8 = scmp.ne.s32.totalorder %s1129_s26, %s742_s9  ;;  %s747_s3 = sshll.u32 %s910_s21, 4  ;;  %s748_s3 = int_to_ptr.vmem [resolvable:$false] %s747_s3 }
  0x5c   : > { %s749_s8 = scalar_lea.vmem %s748_s3, 1024  ;;  %p750_p12 = scmp.lt.s32.totalorder %s1129_s26, %s748_s3 }
  0x5d   : > { %p745_p0 = pnand %p743_p8, %p729_p9  ;;  %p751_p4 = scmp.lt.s32.totalorder %s749_s8, %s742_s9 }
  0x5f   : > { %p746_p5 = pneg %p745_p0  ;;  %p752_p11 = por %p751_p4, %p750_p12 }
  0x61   : > { %p753_p1 = pnand %p752_p11, %p746_p5 }
  0x63   : > { %756 = shalt.err (!%p753_p1)
}
  0x64   : > { %s911_s0 = smov 128   ;;  %s912_s2 = smov 8  }
  0x65   : > { %568 = dma.hbm_to_vmem [thread:$0]  (!%p1298_p7), %s1127_s24, 512, %s1129_s26, %s1131_s7, %s911_s0, %s911_s0, %s912_s2  }
  0x66   : > { %210 = sbr.rel (%p1078_p13) target bundleno = 481 (0x1e1), region = 28  ;;  %s212_s22 = sand.u32 (!%p1078_p13), 1, %s883_s16  }
  0x67   : > { %s520_s30 = sshll.u32 (!%p1078_p13), %s212_s22, 3  ;;  %s213_s4 = scalar_lea.sflag (!%p1078_p13), [#allocation4], %s212_s22 }
  0x68   : > { %s216_s29 = scalar_lea.vmem (!%p1078_p13), [#allocation3], %s520_s30  ;;  %p1299_p12 = scmp.ne.s32.totalorder (!%p1078_p13), %s1284_s27, 0 }
  0x6d   : > { %842 = dma.done.wait (%p1299_p12), %s213_s4, 128  }
  0x6e   : > { %844 = vsyncadd (%p1299_p12), %s213_s4, 4294967168  ;;  %s221_s9 = sand.u32 1, %s871_s13   ;;  %p1300_p5 = scmp.ne.s32.totalorder %s1285_s28, 0 }
  0x6f   : > { %s521_s21 = sshll.u32 %s221_s9, 5  ;;  %s222_s23 = scalar_lea.sflag [#allocation7], %s221_s9 }
  0x70   : > { %s225_s24 = scalar_lea.vmem [#allocation6], %s521_s21 }
  0x71   : > { %846 = dma.done.wait (%p1300_p5), %s222_s23, 512  }
  0x72   : > { %848 = vsyncadd (%p1300_p5), %s222_s23, 4294966784  ;;  %vm257_vm0 = vcmask 261120   ;;  %v913_v0 = vmov 0.0|0.0   ;;  %v914_v1 = vmov 0.0   ;;  %vm915_vm1 = vmmov 0   ;;  %v261_v2 = vld [vmem:[%s225_s24] sm:$0xff] }
  0x73   : > { %549 = vmatprep.subr.bf16.mxu0 %v913_v0  ;;  %258 = vst.msk [vmem:[#allocation2] sm:$0xff] %vm257_vm0, %v914_v1  ;;  %546 = vmatprep.mubr.msk.f32.mxu0 %vm915_vm1, %v914_v1  ;;  %v262_v3 = vld [vmem:[%s225_s24 + $0x8] sm:$0xff]  ;;  %v263_v4 = vld [vmem:[%s225_s24 + $0x10] sm:$0xff]  ;;  %v264_v6 = vld [vmem:[%s225_s24 + $0x18] sm:$0xff]  ;;  %s248_s27 = sand.u32 1, %s859_s10   ;;  %vm345_vm2 = vcmask 64512  }
  0x74   : > { %v550_v5 = vpack.c.bf16 %v262_v3, %v261_v2  ;;  %v553_v7 = vpack.c.bf16 %v264_v6, %v263_v4  ;;  %v260_v8 = vld [vmem:[%s216_s29] sm:$0xff]  ;;  %s522_s28 = sshll.u32 %s248_s27, 5  ;;  %s916_s15 = smov 104  }
  0x75   : > { %s250_s26 = scalar_lea.vmem [#allocation8], %s522_s28  ;;  %s917_s7 = smov 120  }
  0x76   : > { %551 = vmatpush3.bf16.msra.mxu0 %v550_v5  ;;  %s918_s3 = smov 112   ;;  %s555_s8 = smul.u32 12, %s895_s19 }
  0x77   : > { %552 = vmatprep.subr.bf16.mxu0 %v913_v0  ;;  %s528_s0 = sshll.u32 %s891_s18, 2  ;;  %s382_s22 = sshll.u32 %s250_s26, 4  ;;  %s1180_s22 = int_to_ptr.vmem [resolvable:$true] %s382_s22 }
  0x78   : > { %s379_s2 = sadd.s32 %s555_s8, %s528_s0  ;;  %s1301_s9 = sld [smem:[#allocation19_spill]] }
  0x79   : > { %s529_s30 = sshll.u32 %s379_s2, 7  ;;  %s1188_s18 = scalar_lea.sflag [#allocation5], %s248_s27 }
  0x7a   : > { %554 = vmatpush3.bf16.msra.mxu0 %v553_v7  ;;  %v259_v9 = vld [vmem:[#allocation2] sm:$0xff]  ;;  %s757_s21 = scalar_lea.vmem %s1180_s22, 512  ;;  %p1303_p7 = scmp.ne.s32.totalorder %s1293_s12, 0 }
  0x7b   : > { %p758_p13 = scmp.ne.s32.totalorder %s1180_s22, %s757_s21  ;;  %s919_s24 = smov [#allocation8]  }
  0x7c   : > { %s761_s28 = sshll.u32 %s919_s24, 4  ;;  %s762_s28 = int_to_ptr.vmem [resolvable:$false] %s761_s28 }
  0x7d   : > { %547 = vmatmul.mubr.msk.f32.vlgmr.msra.gmra.mrb[0].mxu0 %vm257_vm0, %v260_v8  ;;  %p759_p9 = pnand %p758_p13, %p1303_p7  ;;  %p764_p3 = scmp.lt.s32.totalorder %s1180_s22, %s762_s28 }
  0x7e   : > { %s1302_s23 = smov %s1301_s9  ;;  %s1185_s19 = scalar_lea.hbm %s1301_s9, %s529_s30 }
  0x7f   : > { %p760_p2 = pneg %p759_p9 }
 0x150   : > { %v335_v10 = vpop.f32.mrb[0].mxu0 }
 0x151   : > { %v339_v11 = vadd.f32 %v335_v10, %v259_v9  ;;  %v548_v12 = vpop.f32.mrb[1].mxu0 }
 0x153   : > { %340 = vst.msk [vmem:[#allocation2] sm:$0xff] %vm257_vm0, %v339_v11 }
 0x15a   : > { %v344_v13 = vld [vmem:[#allocation2] sm:$0xff] }
 0x15b   : > { %358 = vrot.lane.b32.xlu1 %v344_v13, %s916_s15  ;;  %346 = vst.msk [vmem:[%s250_s26] sm:$0xff] %vm345_vm2, %v344_v13  ;;  %348 = vrot.lane.b32.xlu0 %v344_v13, %s917_s7  ;;  %s763_s15 = scalar_lea.vmem %s762_s28, 1024 }
 0x15c   : > { %p765_p10 = scmp.lt.s32.totalorder %s763_s15, %s757_s21 }
 0x15e   : > { %p766_p6 = por %p765_p10, %p764_p3 }
 0x15f   : > { %353 = vrot.lane.b32.xlu0 %v344_v13, %s918_s3 }
 0x160   : > { %p767_p8 = pnand %p766_p6, %p760_p2 }
 0x1cd   : > { %v359_v14 = vpop.permute.xlu1 %358  ;;  %v349_v15 = vpop.permute.xlu0 %348 }
 0x1ce   : > { %526 = vst.msk [vmem:[%s250_s26 + $0x18] sm:$0xff] %vm345_vm2, %v359_v14  ;;  %524 = vst.msk [vmem:[%s250_s26 + $0x8] sm:$0xff] %vm345_vm2, %v349_v15 }
 0x1d1   : > { %v354_v16 = vpop.permute.xlu0 %353 }
 0x1d2   : > { %525 = vst.msk [vmem:[%s250_s26 + $0x10] sm:$0xff] %vm345_vm2, %v354_v16 }
 0x1d3   : > { %770 = shalt.err (!%p767_p8)
}
 0x1d4   : > { %s771_s27 = scalar_lea.hbm %s1185_s19, 512  ;;  %s775_s3 = scalar_lea.hbm %s1302_s23, 3072 }
 0x1d5   : > { %p772_p0 = scmp.ne.s32.totalorder %s1185_s19, %s771_s27  ;;  %p776_p1 = scmp.lt.u32.totalorder %s1185_s19, %s1302_s23 }
 0x1d6   : > { %p777_p12 = scmp.lt.u32.totalorder %s775_s3, %s771_s27  ;;  %p779_p13 = scmp.lt.u32.totalorder %s771_s27, %s1185_s19 }
 0x1d7   : > { %p773_p4 = pnand %p772_p0, %p1303_p7 }
 0x1d8   : > { %p778_p5 = por %p777_p12, %p776_p1 }
 0x1d9   : > { %p774_p11 = pneg %p773_p4 }
 0x1da   : > { %p780_p9 = por %p779_p13, %p778_p5 }
 0x1dc   : > { %p781_p2 = pnand %p780_p9, %p774_p11 }
 0x1de   : > { %784 = shalt.err (!%p781_p2)
}
 0x1df   : > { %s920_s2 = smov 128   ;;  %s921_s30 = smov 8  }
 0x1e0   : > { %560 = dma.vmem_to_hbm [thread:$0]  (%p1303_p7), %s1180_s22, 512, %s1185_s19, %s1188_s18, %s920_s2, %s920_s2, %s921_s30  }
 0x1e1 PF: > { %s1304_s4 = sld [smem:[#allocation14_spill]]  ;;  %s1305_s29 = sld [smem:[#allocation12_spill]] }
 0x1e2   : > { %p1306_p10 = scmp.ne.s32.totalorder %s1296_s25, 0 }
 0x1e7   : > { %p574_p3 = scmp.ge.s32.totalorder %s1304_s4, 2  ;;  %s397_s9 = sand.u32 1, %s1305_s29  }
 0x1e8   : > { %s398_s21 = scalar_lea.sflag [#allocation5], %s397_s9 }
 0x1e9   : > { %p570_p6 = pnand %p574_p3, %p1306_p10 }
 0x1eb   : > { %850 = dma.done.wait (!%p570_p6), %s398_s21, 512  }
 0x1ec   : > { %852 = vsyncadd (!%p570_p6), %s398_s21, 4294966784  ;;  %s21_s22 = sadd.s32 1, %s1304_s4   ;;  %s1308_s19 = sld [smem:[#allocation17_spill]] }
 0x1ed   : > { %p1217_p8 = scmp.ge.s32.totalorder %s21_s22, 8   ;;  %s1309_s25 = sld [smem:[#allocation13_spill]] }
 0x1ee   : > { %s1310_s28 = sld [smem:[#allocation15_spill]]  ;;  %s1311_s21 = sld [smem:[#allocation16_spill]] }
 0x1ef   : > { %s1312_s9 = smov %s859_s10  ;;  %s1313_s10 = smov %s863_s11 }
 0x1f0   : > { %s1314_s11 = smov %s1121_s5  ;;  %s1315_s12 = smov %s871_s13 }
 0x1f1   : > { %s1316_s13 = smov %s875_s14  ;;  %s1318_s15 = smov %s883_s16 }
 0x1f2   : > { %s1317_s14 = smov %s1308_s19  ;;  %s1319_s16 = smov %s887_s17 }
 0x1f3   : > { %s1320_s17 = smov %s1118_s6  ;;  %s1321_s18 = smov %s899_s20 }
 0x1f4   : > { %s1322_s19 = smov %s1309_s25  ;;  %s1323_s20 = smov %s1310_s28 }
 0x1f5   :  { %20 = sbr.rel (!%p1217_p8) target bundleno = 15 (0xf), region = 97 }
 0x1fc   :  { %403 = vsyncpa [#allocation4], 1 }
 0x1fd   :  { %405 = vsyncpa [#allocation4 + $0x1], 1 }
 0x1fe   :  { %406 = vsyncpa [#allocation7], 1 }
 0x1ff   :  { %408 = vsyncpa [#allocation7 + $0x1], 1 }
 0x200   :  { %409 = vsyncpa [#allocation5], 1 }
 0x201   :  { %411 = vsyncpa [#allocation5 + $0x1], 1 }

</bundles_post_ra>
